<compile_context>
chip_gen: v6e
topology: v6e:2x2x1
jax: 0.10.0
libtpu: 0.0.40
codegen_flags: <defaults>
</compile_context>

<pallas_src>
import functools

import jax
import jax.numpy as jnp
from jax import lax
from jax.experimental import pallas as pl
from jax.experimental.pallas import tpu as pltpu

LANE = 128


def _round_up(n, m):
    return ((n + m - 1) // m) * m


def _choose_row_tile(p):
    # Largest tile (multiple of 8) that divides P; fall back to the full dim.
    for cand in (1024, 512, 256, 128, 64, 32, 16, 8):
        if p % cand == 0:
            return cand
    return p


def _choose_k_tile(k):
    # Tile K only when it is large; tiles must be multiples of 128 that divide K,
    # otherwise use the full K (allowed: block dim equals the full array dim).
    if k <= 2048:
        return k
    for cand in (2048, 1024, 512):
        if k % cand == 0:
            return cand
    return k


def _vmem_limit_bytes(P, Tp, Tk, Cp, out_isz, mm_isz, num_kt):
    resident_out = P * Cp * out_isz                     # whole-instance output block
    patch_bufs = 2 * Tp * Tk * mm_isz                   # double-buffered patch tiles
    weight_bufs = 2 * Tk * Cp * mm_isz                  # double-buffered weight tiles
    acc = (Tp * Cp * 4) if num_kt > 1 else (8 * LANE * 4)
    stats = 2 * Cp * 4
    finalize_tmp = 3 * Tp * Cp * 4                      # one chunked f32 tile + temps
    est = resident_out + patch_bufs + weight_bufs + acc + stats + finalize_tmp
    # Generous margin; capped well below v5e/v6e's 128 MiB physical VMEM.  On
    # v7x (64 MiB) the working set itself must fit, which the chunked finalize
    # and K tiling are there to ensure.
    return int(min(max(est * 3 // 2 + (8 << 20), 32 << 20), 100 << 20))


# ---------------------------------------------------------------------------
# Pallas kernel: conv-matmul tile (+ optional K accumulation) with single-pass
# InstanceNorm stats; chunked normalize + LeakyReLU at the last tile of each
# instance.
# ---------------------------------------------------------------------------
def _convblock_kernel(p_ref, w_ref, o_ref, acc_ref, sum_ref, sq_ref, *,
                      eps, slope, p_total, num_pt, num_kt):
    # p_ref : (Tp, Tk)   im2col patch rows for this (P, K) tile (bf16 or f32)
    # w_ref : (Tk, Cp)   conv weight K-chunk, Cout zero-padded to Cp
    # o_ref : (P, Cp)    whole-instance output block (resident across P/K tiles)
    # acc_ref : (Tp, Cp) f32 K-accumulator (dummy-sized when num_kt == 1)
    # sum_ref, sq_ref : (1, Cp) f32 running per-channel sum / sum-of-squares
    pt = pl.program_id(1)
    kt = pl.program_id(2)
    tp = p_ref.shape[0]

    @pl.when((pt == 0) & (kt == 0))
    def _init_stats():
        sum_ref[...] = jnp.zeros_like(sum_ref)
        sq_ref[...] = jnp.zeros_like(sq_ref)

    # Conv as matmul on the MXU, f32 accumulation.  K is NOT padded to a 128
    # multiple in HBM; Mosaic handles the non-aligned contraction internally.
    part = jnp.dot(p_ref[...], w_ref[...], preferred_element_type=jnp.float32)

    if num_kt > 1:
        @pl.when(kt == 0)
        def _init_acc():
            acc_ref[...] = jnp.zeros_like(acc_ref)

        acc_ref[...] += part

    @pl.when(kt == num_kt - 1)
    def _stats_and_store():
        y = part if num_kt == 1 else acc_ref[...]
        # Single-pass InstanceNorm statistics in f32.
        # NOTE: E[x^2] - mean^2 can cancel when |mean| >> std; the max(.,0)
        # clamp below keeps it finite (Welford/two-pass behind a flag is the
        # follow-up if ill-conditioned channels matter).
        sum_ref[...] += jnp.sum(y, axis=0, keepdims=True)
        sq_ref[...] += jnp.sum(y * y, axis=0, keepdims=True)
        start = pl.multiple_of(pt * tp, tp)
        o_ref[pl.ds(start, tp), :] = y.astype(o_ref.dtype)

    # Finalize once all (P, K) tiles of this instance have been accumulated.
    @pl.when((pt == num_pt - 1) & (kt == num_kt - 1))
    def _finalize():
        inv_p = jnp.float32(1.0 / p_total)
        mean = sum_ref[...] * inv_p                                 # (1, Cp)
        var = jnp.maximum(sq_ref[...] * inv_p - mean * mean, 0.0)   # biased var
        scale = lax.rsqrt(var + jnp.float32(eps))                   # EUP rsqrt

        # Chunked normalize + LeakyReLU: f32 temporaries are bounded to one
        # (Tp, Cp) tile instead of two whole (P, Cp) slabs -> VMEM headroom
        # (mandatory on v7x's 64 MiB), no extra HBM traffic.
        @pl.loop(0, num_pt)
        def _chunk(i):
            start = pl.multiple_of(i * tp, tp)
            yf = o_ref[pl.ds(start, tp), :].astype(jnp.float32)
            yn = (yf - mean) * scale
            yn = jnp.where(yn >= 0, yn, jnp.float32(slope) * yn)    # LeakyReLU
            o_ref[pl.ds(start, tp), :] = yn.astype(o_ref.dtype)


def convblock_pallas(x, weight, bias=None, *, stride=2, padding=1, eps=1e-5,
                     slope=0.2, matmul_dtype=jnp.bfloat16, out_dtype=None,
                     out_layout="NCHW"):
    """Conv2d(stride, padding) -> InstanceNorm2d(affine=False) -> LeakyReLU(slope).

    x: [B, Cin, H, W] (NCHW).  weight: [Cout, Cin, kh, kw].
    `bias` is accepted for interface parity but intentionally unused: a
    per-channel constant added before a non-affine InstanceNorm cancels
    exactly.  (Only valid for this exact module config.)
    """
    del bias  # mathematically a no-op before InstanceNorm(affine=False)

    B, Cin, H, W = x.shape
    Cout, cin_w, kh, kw = weight.shape
    assert cin_w == Cin
    Hout = (H + 2 * padding - kh) // stride + 1
    Wout = (W + 2 * padding - kw) // stride + 1
    P = Hout * Wout
    K = Cin * kh * kw
    Cp = _round_up(Cout, LANE)
    Tp = _choose_row_tile(P)
    Tk = _choose_k_tile(K)
    num_pt = P // Tp
    num_kt = K // Tk
    out_dtype = x.dtype if out_dtype is None else jnp.dtype(out_dtype)

    # ---- im2col in NHWC / tap-major order (wrapper glue, plain JAX).  The
    # patch stream is kept at its true K width (no HBM K->128 padding) and in
    # matmul_dtype (bf16 by default -> half the HBM traffic).
    # TODO(synk): replace with in-kernel patch construction from a halo-DMA'd
    # NHWC row strip of x to remove the kh*kw/stride^2 HBM inflation entirely.
    x_nhwc = jnp.transpose(x, (0, 2, 3, 1))                          # [B,H,W,Cin]
    xp = jnp.pad(x_nhwc,
                 ((0, 0), (padding, padding), (padding, padding), (0, 0)))
    taps = []
    for di in range(kh):
        for dj in range(kw):
            taps.append(xp[:, di:di + stride * Hout:stride,
                           dj:dj + stride * Wout:stride, :])         # [B,Ho,Wo,Cin]
    patches = jnp.stack(taps, axis=3)                                # [B,Ho,Wo,T,Cin]
    patches = patches.reshape(B, P, K).astype(matmul_dtype)          # [B,P,K]

    # Weight in matching K order ((di*kw + dj)*Cin + c); only Cout is padded to
    # Cp (lane-dense output columns), K stays unpadded.
    w2d = jnp.transpose(weight, (2, 3, 1, 0)).reshape(K, Cout).astype(matmul_dtype)
    w2d = jnp.pad(w2d, ((0, 0), (0, Cp - Cout)))                     # [K,Cp]

    kernel = functools.partial(_convblock_kernel, eps=eps, slope=slope,
                               p_total=P, num_pt=num_pt, num_kt=num_kt)

    mm_isz = jnp.dtype(matmul_dtype).itemsize
    out_isz = jnp.dtype(out_dtype).itemsize
    cost = pl.CostEstimate(
        flops=2 * B * P * K * Cp,
        transcendentals=0,
        bytes_accessed=(patches.size * mm_isz + w2d.size * mm_isz
                        + B * P * Cp * out_isz),
    )

    acc_shape = (Tp, Cp) if num_kt > 1 else (8, LANE)   # dummy when K untiled
    vmem_limit = _vmem_limit_bytes(P, Tp, Tk, Cp, out_isz, mm_isz, num_kt)

    out = pl.pallas_call(
        kernel,
        out_shape=jax.ShapeDtypeStruct((B, P, Cp), out_dtype),
        grid_spec=pltpu.PrefetchScalarGridSpec(
            num_scalar_prefetch=0,
            grid=(B, num_pt, num_kt),
            in_specs=[
                # Patch tile: last dim Tk either a 128-multiple or the full K.
                pl.BlockSpec((None, Tp, Tk), lambda b, p, k: (b, p, k)),
                # Weight K-chunk (constant across b, p).
                pl.BlockSpec((Tk, Cp), lambda b, p, k: (k, 0)),
            ],
            # Whole-instance output block stays resident across P/K tiles.
            out_specs=pl.BlockSpec((None, P, Cp), lambda b, p, k: (b, 0, 0)),
            scratch_shapes=[pltpu.VMEM(acc_shape, jnp.float32),
                            pltpu.VMEM((1, Cp), jnp.float32),
                            pltpu.VMEM((1, Cp), jnp.float32)],
        ),
        compiler_params=pltpu.CompilerParams(
            dimension_semantics=("parallel", "arbitrary", "arbitrary"),
            vmem_limit_bytes=vmem_limit),
        cost_estimate=cost,
    )(patches, w2d)

    out = out[:, :, :Cout].reshape(B, Hout, Wout, Cout)              # NHWC
    if out_layout == "NHWC":
        return out                                                   # skip transpose
    return jnp.transpose(out, (0, 3, 1, 2))                          # NCHW


# ---------------------------------------------------------------------------
# Pure-JAX reference (includes the bias, to prove the no-op claim numerically).
# ---------------------------------------------------------------------------
def convblock_ref(x, weight, bias, *, stride=2, padding=1, eps=1e-5, slope=0.2):
    y = lax.conv_general_dilated(
        x, weight, window_strides=(stride, stride),
        padding=[(padding, padding), (padding, padding)],
        dimension_numbers=("NCHW", "OIHW", "NCHW"))
    y = y + bias.reshape(1, -1, 1, 1)
    mean = jnp.mean(y, axis=(2, 3), keepdims=True)
    var = jnp.mean((y - mean) ** 2, axis=(2, 3), keepdims=True)
    y = (y - mean) / jnp.sqrt(var + eps)
    return jnp.where(y >= 0, y, slope * y)


if __name__ == "__main__":
    key = jax.random.PRNGKey(0)
    kx, kw_, kb = jax.random.split(key, 3)

    B, Cin, H, W = 2, 4, 16, 16
    Cout, kh, kwid = 8, 4, 4

    x = jax.random.normal(kx, (B, Cin, H, W), dtype=jnp.float32)
    weight = jax.random.normal(kw_, (Cout, Cin, kh, kwid), dtype=jnp.float32) * 0.1
    bias = jax.random.normal(kb, (Cout,), dtype=jnp.float32) * 0.1

    ref = convblock_ref(x, weight, bias, stride=2, padding=1)

    # f32 matmul path: tight check against the XLA conv reference.
    out_f32 = convblock_pallas(x, weight, bias, stride=2, padding=1,
                               matmul_dtype=jnp.float32)
    out_f32 = jax.block_until_ready(out_f32)
    assert out_f32.shape == ref.shape == (B, Cout, 8, 8), out_f32.shape
    assert jnp.allclose(out_f32, ref, atol=1e-4, rtol=1e-4), \
        float(jnp.max(jnp.abs(out_f32 - ref)))

    # bf16 matmul path (default: halves HBM/VMEM traffic, 2x MXU throughput).
    out_bf16 = convblock_pallas(x, weight, bias, stride=2, padding=1)
    out_bf16 = jax.block_until_ready(out_bf16)
    assert out_bf16.shape == ref.shape
    assert jnp.allclose(out_bf16, ref, atol=5e-2, rtol=5e-2), \
        float(jnp.max(jnp.abs(out_bf16 - ref)))

    # NHWC output path (layer chains skip the post-kernel transpose copy).
    out_nhwc = convblock_pallas(x, weight, bias, stride=2, padding=1,
                                out_layout="NHWC")
    out_nhwc = jax.block_until_ready(out_nhwc)
    assert out_nhwc.shape == (B, 8, 8, Cout)
    assert jnp.allclose(jnp.transpose(out_nhwc, (0, 3, 1, 2)), ref,
                        atol=5e-2, rtol=5e-2)

    print("KERNEL_OK")
</pallas_src>

<mosaic_0001>
module attributes {stable_mosaic.version = 11 : i64} {
  func.func @_convblock_kernel(%arg0: i32, %arg1: i32, %arg2: i32, %arg3: memref<1x64x64xf32, #tpu.memory_space<vmem>>, %arg4: memref<64x128xf32, #tpu.memory_space<vmem>>, %arg5: memref<1x64x128xf32, #tpu.memory_space<vmem>>, %arg6: memref<8x128xf32, #tpu.memory_space<vmem>>, %arg7: memref<1x128xf32, #tpu.memory_space<vmem>>, %arg8: memref<1x128xf32, #tpu.memory_space<vmem>>) attributes {dimension_semantics = [#tpu.dimension_semantics<parallel>, #tpu.dimension_semantics<arbitrary>, #tpu.dimension_semantics<arbitrary>], iteration_bounds = array<i64: 2, 1, 1>, scalar_prefetch = 0 : i64, scratch_operands = 3 : i64, tpu.core_type = #tpu.core_type<tc>, window_params = [{transform_indices = @transform_0, window_bounds = array<i64: 1, 64, 64>}, {transform_indices = @transform_1, window_bounds = array<i64: 64, 128>}, {transform_indices = @transform_2, window_bounds = array<i64: 1, 64, 128>}]} {
    %c0_i32 = arith.constant 0 : i32
    %0 = arith.cmpi eq, %arg1, %c0_i32 : i32
    %c0_i32_0 = arith.constant 0 : i32
    %1 = arith.cmpi eq, %arg2, %c0_i32_0 : i32
    %2 = arith.andi %0, %1 : i1
    %3 = arith.extui %2 : i1 to i32
    %c0_i32_1 = arith.constant 0 : i32
    %4 = arith.cmpi ne, %3, %c0_i32_1 : i32
    scf.if %4 {
      %cst_11 = arith.constant 0.000000e+00 : f32
      %17 = vector.broadcast %cst_11 : f32 to vector<1x128xf32>
      %c0_12 = arith.constant 0 : index
      %c0_13 = arith.constant 0 : index
      %18 = vector.load %arg7[%c0_12, %c0_13] : memref<1x128xf32, #tpu.memory_space<vmem>>, vector<1x128xf32>
      tpu.vector_store %arg7[%c0_12, %c0_13], %17 {strides = array<i32>} : memref<1x128xf32, #tpu.memory_space<vmem>>, vector<1x128xf32>,
      %cst_14 = arith.constant 0.000000e+00 : f32
      %19 = vector.broadcast %cst_14 : f32 to vector<1x128xf32>
      %c0_15 = arith.constant 0 : index
      %c0_16 = arith.constant 0 : index
      %20 = vector.load %arg8[%c0_15, %c0_16] : memref<1x128xf32, #tpu.memory_space<vmem>>, vector<1x128xf32>
      tpu.vector_store %arg8[%c0_15, %c0_16], %19 {strides = array<i32>} : memref<1x128xf32, #tpu.memory_space<vmem>>, vector<1x128xf32>,
    } else {
    }
    %c0 = arith.constant 0 : index
    %c0_2 = arith.constant 0 : index
    %c0_3 = arith.constant 0 : index
    %5 = vector.load %arg3[%c0, %c0_2, %c0_3] : memref<1x64x64xf32, #tpu.memory_space<vmem>>, vector<1x64x64xf32>
    %6 = vector.shape_cast %5 : vector<1x64x64xf32> to vector<64x64xf32>
    %c0_4 = arith.constant 0 : index
    %c0_5 = arith.constant 0 : index
    %7 = vector.load %arg4[%c0_4, %c0_5] : memref<64x128xf32, #tpu.memory_space<vmem>>, vector<64x128xf32>
    %cst = arith.constant dense<0.000000e+00> : vector<64x128xf32>
    %8 = tpu.matmul %6, %7, %cst {dimension_numbers = #tpu.dot_dimension_numbers<[1], [0], [0], [1], [0, 0, 1, 1], [], []>} : vector<64x64xf32>, vector<64x128xf32>, vector<64x128xf32> -> vector<64x128xf32>
    %c0_i32_6 = arith.constant 0 : i32
    %9 = arith.cmpi eq, %arg2, %c0_i32_6 : i32
    %10 = arith.extui %9 : i1 to i32
    %c0_i32_7 = arith.constant 0 : i32
    %11 = arith.cmpi ne, %10, %c0_i32_7 : i32
    scf.if %11 {
      %c0_11 = arith.constant 0 : index
      %c0_12 = arith.constant 0 : index
      %17 = vector.load %arg7[%c0_11, %c0_12] : memref<1x128xf32, #tpu.memory_space<vmem>>, vector<1x128xf32>
      %cst_13 = arith.constant dense<0.000000e+00> : vector<128xf32>
      %18 = vector.multi_reduction <add>, %8, %cst_13 [0] : vector<64x128xf32> to vector<128xf32>
      %19 = vector.shape_cast %18 : vector<128xf32> to vector<1x128xf32>
      %20 = arith.addf %17, %19 : vector<1x128xf32>
      %c0_14 = arith.constant 0 : index
      %c0_15 = arith.constant 0 : index
      %21 = vector.load %arg7[%c0_14, %c0_15] : memref<1x128xf32, #tpu.memory_space<vmem>>, vector<1x128xf32>
      tpu.vector_store %arg7[%c0_14, %c0_15], %20 {strides = array<i32>} : memref<1x128xf32, #tpu.memory_space<vmem>>, vector<1x128xf32>,
      %c0_16 = arith.constant 0 : index
      %c0_17 = arith.constant 0 : index
      %22 = vector.load %arg8[%c0_16, %c0_17] : memref<1x128xf32, #tpu.memory_space<vmem>>, vector<1x128xf32>
      %23 = arith.mulf %8, %8 : vector<64x128xf32>
      %cst_18 = arith.constant dense<0.000000e+00> : vector<128xf32>
      %24 = vector.multi_reduction <add>, %23, %cst_18 [0] : vector<64x128xf32> to vector<128xf32>
      %25 = vector.shape_cast %24 : vector<128xf32> to vector<1x128xf32>
      %26 = arith.addf %22, %25 : vector<1x128xf32>
      %c0_19 = arith.constant 0 : index
      %c0_20 = arith.constant 0 : index
      %27 = vector.load %arg8[%c0_19, %c0_20] : memref<1x128xf32, #tpu.memory_space<vmem>>, vector<1x128xf32>
      tpu.vector_store %arg8[%c0_19, %c0_20], %26 {strides = array<i32>} : memref<1x128xf32, #tpu.memory_space<vmem>>, vector<1x128xf32>,
      %c64_i32 = arith.constant 64 : i32
      %28 = arith.muli %arg1, %c64_i32 : i32
      %29 = tpu.assume_multiple %28, 64 : i32
      %c0_21 = arith.constant 0 : index
      %30 = arith.index_cast %29 : i32 to index
      %c0_22 = arith.constant 0 : index
      %31 = vector.load %arg5[%c0_21, %30, %c0_22] : memref<1x64x128xf32, #tpu.memory_space<vmem>>, vector<1x64x128xf32>
      %32 = vector.shape_cast %31 : vector<1x64x128xf32> to vector<64x128xf32>
      %33 = vector.shape_cast %8 : vector<64x128xf32> to vector<1x64x128xf32>
      tpu.vector_store %arg5[%c0_21, %30, %c0_22], %33 {strides = array<i32>} : memref<1x64x128xf32, #tpu.memory_space<vmem>>, vector<1x64x128xf32>,
    } else {
    }
    %c0_i32_8 = arith.constant 0 : i32
    %12 = arith.cmpi eq, %arg1, %c0_i32_8 : i32
    %c0_i32_9 = arith.constant 0 : i32
    %13 = arith.cmpi eq, %arg2, %c0_i32_9 : i32
    %14 = arith.andi %12, %13 : i1
    %15 = arith.extui %14 : i1 to i32
    %c0_i32_10 = arith.constant 0 : i32
    %16 = arith.cmpi ne, %15, %c0_i32_10 : i32
    scf.if %16 {
      %c0_11 = arith.constant 0 : index
      %c0_12 = arith.constant 0 : index
      %17 = vector.load %arg7[%c0_11, %c0_12] : memref<1x128xf32, #tpu.memory_space<vmem>>, vector<1x128xf32>
      %cst_13 = arith.constant 1.562500e-02 : f32
      %18 = vector.broadcast %cst_13 : f32 to vector<1x128xf32>
      %19 = arith.mulf %17, %18 : vector<1x128xf32>
      %c0_14 = arith.constant 0 : index
      %c0_15 = arith.constant 0 : index
      %20 = vector.load %arg8[%c0_14, %c0_15] : memref<1x128xf32, #tpu.memory_space<vmem>>, vector<1x128xf32>
      %cst_16 = arith.constant 1.562500e-02 : f32
      %21 = vector.broadcast %cst_16 : f32 to vector<1x128xf32>
      %22 = arith.mulf %20, %21 : vector<1x128xf32>
      %23 = arith.mulf %19, %19 : vector<1x128xf32>
      %24 = arith.subf %22, %23 : vector<1x128xf32>
      %cst_17 = arith.constant 0.000000e+00 : f32
      %25 = vector.broadcast %cst_17 : f32 to vector<1x128xf32>
      %26 = arith.maximumf %24, %25 : vector<1x128xf32>
      %cst_18 = arith.constant 9.99999974E-6 : f32
      %27 = vector.broadcast %cst_18 : f32 to vector<1x128xf32>
      %28 = arith.addf %26, %27 : vector<1x128xf32>
      %29 = math.rsqrt %28 : vector<1x128xf32>
      %c0_i32_19 = arith.constant 0 : i32
      %c1_i32 = arith.constant 1 : i32
      %30 = arith.muli %c0_i32_19, %c1_i32 : i32
      %c0_i32_20 = arith.constant 0 : i32
      %31 = arith.addi %c0_i32_20, %30 : i32
      %c64_i32 = arith.constant 64 : i32
      %32 = arith.muli %31, %c64_i32 : i32
      %33 = tpu.assume_multiple %32, 64 : i32
      %c0_21 = arith.constant 0 : index
      %34 = arith.index_cast %33 : i32 to index
      %c0_22 = arith.constant 0 : index
      %35 = vector.load %arg5[%c0_21, %34, %c0_22] : memref<1x64x128xf32, #tpu.memory_space<vmem>>, vector<1x64x128xf32>
      %36 = vector.shape_cast %35 : vector<1x64x128xf32> to vector<64x128xf32>
      %37 = vector.broadcast %19 : vector<1x128xf32> to vector<64x128xf32>
      %38 = arith.subf %36, %37 : vector<64x128xf32>
      %39 = vector.broadcast %29 : vector<1x128xf32> to vector<64x128xf32>
      %40 = arith.mulf %38, %39 : vector<64x128xf32>
      %cst_23 = arith.constant 0.000000e+00 : f32
      %41 = vector.broadcast %cst_23 : f32 to vector<64x128xf32>
      %42 = arith.cmpf oge, %40, %41 : vector<64x128xf32>
      %cst_24 = arith.constant 2.000000e-01 : f32
      %43 = vector.broadcast %cst_24 : f32 to vector<64x128xf32>
      %44 = arith.mulf %43, %40 : vector<64x128xf32>
      %45 = arith.select %42, %40, %44 : vector<64x128xi1>, vector<64x128xf32>
      %c0_25 = arith.constant 0 : index
      %46 = arith.index_cast %33 : i32 to index
      %c0_26 = arith.constant 0 : index
      %47 = vector.load %arg5[%c0_25, %46, %c0_26] : memref<1x64x128xf32, #tpu.memory_space<vmem>>, vector<1x64x128xf32>
      %48 = vector.shape_cast %47 : vector<1x64x128xf32> to vector<64x128xf32>
      %49 = vector.shape_cast %45 : vector<64x128xf32> to vector<1x64x128xf32>
      tpu.vector_store %arg5[%c0_25, %46, %c0_26], %49 {strides = array<i32>} : memref<1x64x128xf32, #tpu.memory_space<vmem>>, vector<1x64x128xf32>,
      %c1_i32_27 = arith.constant 1 : i32
    } else {
    }
    return
  }
  func.func @transform_0(%arg0: i32, %arg1: i32, %arg2: i32) -> (i32, i32, i32) {
    %c0_i32 = arith.constant 0 : i32
    return %arg0, %arg1, %arg2 : i32, i32, i32
  }
  func.func @transform_1(%arg0: i32, %arg1: i32, %arg2: i32) -> (i32, i32) {
    %c0_i32 = arith.constant 0 : i32
    %c0_i32_0 = arith.constant 0 : i32
    return %arg2, %c0_i32 : i32, i32
  }
  func.func @transform_2(%arg0: i32, %arg1: i32, %arg2: i32) -> (i32, i32, i32) {
    %c0_i32 = arith.constant 0 : i32
    %c0_i32_0 = arith.constant 0 : i32
    %c0_i32_1 = arith.constant 0 : i32
    return %arg0, %c0_i32, %c0_i32_0 : i32, i32, i32
  }
}

</mosaic_0001>

<bundles_post_ra>
// kernel: tpu_custom_call.1
= control target key start
LH: loop header
LB: loop body
LE: loop exit
PB: predicated region body
PF: predicated region fallthrough
CT: control target
= control target key end

     0   :  { %7 = vsyncpa [#allocation6], 0  ;;  %s1203_s0 = inlined_call_operand.hbm [shape: f32[2,64,64], index: 0, kind: input, shape index: {}]   ;;  %s1204_s1 = inlined_call_operand.hbm [shape: f32[64,128], index: 1, kind: input, shape index: {}]   ;;  %s1205_s2 = inlined_call_operand.hbm [shape: f32[2,64,128], index: 2, kind: output, shape index: {}]  }
   0x1   :  { %9 = vsyncpa [#allocation6 + $0x1], 0 }
   0x2   :  { %10 = vsyncpa [#allocation9], 0 }
   0x3   :  { %11 = vsyncpa [#allocation7], 0 }
   0x4   :  { %13 = vsyncpa [#allocation7 + $0x1], 0  ;;  %s945_s9 = smov 0   ;;  %s947_s10 = smov 0  }
   0x5   :  { %s949_s11 = smov 0   ;;  %s951_s12 = smov 0  }
   0x6   :  { %s953_s13 = smov 0   ;;  %s955_s14 = smov 0  }
   0x7 LB: > { %s615_s15 = sadd.s32 4294967295, %s920_s14   ;;  %s616_s16 = sadd.s32 4294967294, %s920_s14   ;;  %s920_s14 = sphi %s955_s14, %s19_s14   ;;  %s916_s13 = sphi %s953_s13, %s1225_s13   ;;  %s912_s12 = sphi %s951_s12, %s1224_s12   ;;  %s908_s11 = sphi %s949_s11, %s1223_s11   ;;  %s904_s10 = sphi %s947_s10, %s1222_s10   ;;  %s900_s9 = sphi %s945_s9, %s1221_s9  }
   0x8   : > { %p62_p0 = scmp.ne.s32.totalorder %s904_s10, %s900_s9  ;;  %p979_p1 = scmp.eq.s32.totalorder %s615_s15, 0 }
   0x9   : > { %p983_p2 = scmp.eq.s32.totalorder %s615_s15, 1  ;;  %p118_p3 = scmp.eq.s32.totalorder %s616_s16, 1 }
   0xa   : > { %p989_p4 = por %p979_p1, %p62_p0  ;;  %p617_p5 = scmp.ge.s32.totalorder %s920_s14, 1 }
   0xb   : > { %p994_p6 = por %p118_p3, %p62_p0  ;;  %p125_p7 = scmp.lt.s32.totalorder %s920_s14, 3 }
   0xc   : > { %s1210_s19 = scalar_select %p989_p4, 1, 0 }
   0xd   : > { %s1211_s20 = scalar_select %p994_p6, 1, 0 }
   0xe   : > { %p999_p8 = pnand %p617_p5, %p125_p7  ;;  %s922_s22 = smov [#allocation8]  }
   0xf   : > { %s140_s23 = sshll.u32 %s922_s22, 4  ;;  %s38_s25 = sadd.s32 1, %s916_s13  ;;  %s141_s23 = int_to_ptr.vmem [resolvable:$true] %s140_s23 }
  0x10   : > { %p710_p9 = pneg %p999_p8  ;;  %s793_s26 = scalar_lea.vmem %s141_s23, 1024 }
  0x11   : > { %p794_p13 = scmp.ne.s32.totalorder %s141_s23, %s793_s26  ;;  %p801_p5 = scmp.lt.s32.totalorder %s141_s23, %s141_s23 }
  0x12   : > { %p1008_p11 = pnand %p710_p9, %p979_p1  ;;  %p802_p7 = scmp.lt.s32.totalorder %s793_s26, %s793_s26 }
  0x14   : > { %p784_p12 = pneg %p1008_p11  ;;  %p803_p6 = por %p802_p7, %p801_p5 }
  0x16   : > { %p796_p0 = pnand %p794_p13, %p784_p12 }
  0x18   : > { %p797_p3 = pneg %p796_p0 }
  0x1a   : > { %p804_p4 = pnand %p803_p6, %p797_p3 }
  0x1c   : > { %807 = shalt.err (!%p804_p4)
}
  0x1d   : > { %s1207_s27 = smov 128   ;;  %s924_s28 = smov 8  }
  0x1e   : > { %713 = dma.hbm_to_vmem [thread:$0]  (!%p1008_p11), %s1204_s1, 1024, %s141_s23, [#allocation9], %s1207_s27, %s1207_s27, %s924_s28  }
  0x1f   : > { %p40_p4 = scmp.ge.s32.totalorder %s38_s25, 2  ;;  %s49_s3 = sadd.s32 1, %s908_s11 }
  0x20   : > { %p56_p6 = scmp.ne.s32.totalorder %s908_s11, %s904_s10  ;;  %p57_p9 = scmp.eq.s32.totalorder %s920_s14, 0 }
  0x21   : > { %s1227_s25 = smov (%p40_p4, %s38_s25), 0  ;;  %p723_p0 = scmp.lt.s32.totalorder %s920_s14, 2 }
  0x22   : > { %p1029_p12 = por %p57_p9, %p56_p6  ;;  %p1035_p13 = por %p983_p2, %p56_p6 }
  0x23   : > { %s42_s6 = ssub.s32 %s916_s13, %s1227_s25  ;;  %s154_s7 = sand.u32 1, %s908_s11  }
  0x24   : > { %p47_p11 = scmp.eq.s32.totalorder %s42_s6, 0  ;;  %s620_s8 = sshll.u32 %s154_s7, 6 }
  0x25   : > { %s640_s16 = sshll.u32 %s916_s13, 10  ;;  %s158_s26 = scalar_lea.vmem [#allocation5], %s620_s8 }
  0x26   : > { %s1044_s15 = scalar_select %p47_p11, %s908_s11, %s49_s3  }
  0x27   : > { %s167_s24 = scalar_lea.hbm %s1203_s0, %s640_s16  ;;  %s168_s29 = sshll.u32 %s158_s26, 4  ;;  %s169_s29 = int_to_ptr.vmem [resolvable:$true] %s168_s29 }
  0x28   : > { %p1052_p2 = pnand %p723_p0, %p1029_p12  ;;  %s155_s30 = scalar_lea.sflag [#allocation6], %s154_s7 }
  0x29   : > { %s821_s6 = scalar_lea.vmem %s169_s29, 1024  ;;  %s925_s3 = smov [#allocation5]  }
  0x2a   : > { %p810_p3 = pneg %p1052_p2  ;;  %p822_p5 = scmp.ne.s32.totalorder %s169_s29, %s821_s6 }
  0x2b   : > { %s826_s27 = sshll.u32 %s925_s3, 4  ;;  %s827_s27 = int_to_ptr.vmem [resolvable:$false] %s826_s27 }
  0x2c   : > { %p824_p7 = pnand %p822_p5, %p810_p3  ;;  %s828_s16 = scalar_lea.vmem %s827_s27, 2048 }
  0x2d   : > { %p829_p6 = scmp.lt.s32.totalorder %s169_s29, %s827_s27  ;;  %p830_p9 = scmp.lt.s32.totalorder %s828_s16, %s821_s6 }
  0x2e   : > { %p825_p4 = pneg %p824_p7 }
  0x2f   : > { %p831_p11 = por %p830_p9, %p829_p6 }
  0x31   : > { %p832_p10 = pnand %p831_p11, %p825_p4 }
  0x33   : > { %835 = shalt.err (!%p832_p10)
}
  0x34   : > { %s1217_s4 = smov 128   ;;  %180 = sbr.rel (%p999_p8) target bundleno = 360 (0x168), region = 28 }
  0x35   : > { %717 = dma.hbm_to_vmem [thread:$0]  (!%p1052_p2), %s167_s24, 1024, %s169_s29, %s155_s30, %s1217_s4, %s1217_s4, %s924_s28  }
  0x36   : > { %s1066_s7 = sand.u32 (!%p999_p8), 1, %s904_s10   ;;  %p1218_p10 = scmp.ne.s32.totalorder (!%p999_p8), %s1210_s19, 0 }
  0x37   : > { %s624_s27 = sshll.u32 (!%p999_p8), %s1066_s7, 6  ;;  %s183_s8 = scalar_lea.sflag (!%p999_p8), [#allocation6], %s1066_s7 }
  0x38   : > { %s1072_s22 = scalar_lea.vmem (!%p999_p8), [#allocation5], %s624_s27 }
  0x39   : > { %887 = dma.done.wait (%p1218_p10), %s183_s8, 1024  }
  0x3a   : > { %889 = vsyncadd (%p1218_p10), %s183_s8, 4294966272 }
  0x3b   : > { %891 = dma.done.wait (%p979_p1), [#allocation9], 1024  }
  0x3c   : > { %893 = vsyncadd (%p979_p1), [#allocation9], 4294966272  ;;  %v236_v0 = vld [vmem:[#allocation8 + $0x38] sm:$0xff]  ;;  %v235_v1 = vld [vmem:[#allocation8 + $0x30] sm:$0xff]  ;;  %vm237_vm0 = vcmask 523264   ;;  %v926_v16 = vmov 0.0  }
  0x3d   : > { %658 = vmatprep.subr.mxu0 %v236_v0  ;;  %686 = vmatprep.subr.mxu1 %v236_v0  ;;  %v234_v2 = vld [vmem:[#allocation8 + $0x28] sm:$0xff]  ;;  %v233_v3 = vld [vmem:[#allocation8 + $0x20] sm:$0xff]  ;;  %v232_v4 = vld [vmem:[#allocation8 + $0x18] sm:$0xff]  ;;  %219 = vst [vmem:[#allocation3] sm:$0x1] %v926_v16  ;;  %s641_s17 = sshll.u32 %s912_s12, 10 }
  0x3e   : > { %659 = vmatpush3.msra.mxu0 %v236_v0  ;;  %694 = vmatpush3.msra.mxu1 %v236_v0  ;;  %v231_v5 = vld [vmem:[#allocation8 + $0x10] sm:$0xff]  ;;  %v221_v6 = vld [vmem:[%s1072_s22] sm:$0xff]  ;;  %v230_v7 = vld [vmem:[#allocation8 + $0x8] sm:$0xff]  ;;  %220 = vst [vmem:[#allocation4] sm:$0x1] %v926_v16  ;;  %s210_s19 = scalar_lea.vmem [#allocation10], %s624_s27  ;;  %s1148_s23 = scalar_lea.hbm %s1205_s2, %s641_s17 }
  0x3f   : > { %660 = vmatprep.subr.mxu0 %v235_v1  ;;  %687 = vmatprep.subr.mxu1 %v235_v1  ;;  %v229_v8 = vld [vmem:[#allocation8] sm:$0xff]  ;;  %v222_v9 = vld [vmem:[%s1072_s22 + $0x8] sm:$0xff]  ;;  %v223_v10 = vld [vmem:[%s1072_s22 + $0x10] sm:$0xff]  ;;  %s513_s21 = sshll.u32 %s210_s19, 4  ;;  %s500_s24 = scalar_lea.sflag [#allocation7], %s1066_s7  ;;  %s1150_s21 = int_to_ptr.vmem [resolvable:$true] %s513_s21 }
  0x40   : > { %661 = vmatpush3.msra.mxu0 %v235_v1  ;;  %695 = vmatpush3.msra.mxu1 %v235_v1  ;;  %v225_v11 = vld [vmem:[%s1072_s22 + $0x20] sm:$0xff]  ;;  %v226_v12 = vld [vmem:[%s1072_s22 + $0x28] sm:$0xff]  ;;  %v227_v13 = vld [vmem:[%s1072_s22 + $0x30] sm:$0xff]  ;;  %s836_s26 = scalar_lea.vmem %s1150_s21, 1024  ;;  %s927_s29 = smov [#allocation10]  }
  0x41   : > { %662 = vmatprep.subr.mxu0 %v234_v2  ;;  %688 = vmatprep.subr.mxu1 %v234_v2  ;;  %v224_v14 = vld [vmem:[%s1072_s22 + $0x18] sm:$0xff]  ;;  %p837_p1 = scmp.ne.s32.totalorder %s1150_s21, %s836_s26  ;;  %s840_s18 = sshll.u32 %s927_s29, 4  ;;  %s841_s18 = int_to_ptr.vmem [resolvable:$false] %s840_s18 }
  0x42   : > { %663 = vmatpush3.msra.mxu0 %v234_v2  ;;  %696 = vmatpush3.msra.mxu1 %v234_v2  ;;  %v228_v15 = vld [vmem:[%s1072_s22 + $0x38] sm:$0xff]  ;;  %s842_s30 = scalar_lea.vmem %s841_s18, 2048  ;;  %p843_p0 = scmp.lt.s32.totalorder %s1150_s21, %s841_s18 }
  0x43   : > { %664 = vmatprep.subr.mxu0 %v233_v3  ;;  %689 = vmatprep.subr.mxu1 %v233_v3  ;;  %p838_p8 = pnand %p837_p1, %p1035_p13  ;;  %p844_p2 = scmp.lt.s32.totalorder %s842_s30, %s836_s26 }
  0x44   : > { %665 = vmatpush3.msra.mxu0 %v233_v3  ;;  %697 = vmatpush3.msra.mxu1 %v233_v3  ;;  %v370_v56 = vld [vmem:[#allocation3] sm:$0x1] }
  0x45   : > { %666 = vmatprep.subr.mxu0 %v232_v4  ;;  %690 = vmatprep.subr.mxu1 %v232_v4  ;;  %v386_v59 = vld [vmem:[#allocation4] sm:$0x1]  ;;  %p839_p12 = pneg %p838_p8  ;;  %p845_p3 = por %p844_p2, %p843_p0 }
  0x46   : > { %667 = vmatpush3.msra.mxu0 %v232_v4  ;;  %698 = vmatpush3.msra.mxu1 %v232_v4 }
  0x47   : > { %668 = vmatprep.subr.mxu0 %v231_v5  ;;  %674 = vmatprep.mubr.msk.f32.mxu0 %vm237_vm0, %v221_v6  ;;  %v440_v6 = vlaneseq  ;;  %p846_p5 = pnand %p845_p3, %p839_p12 }
  0x48   : > { %669 = vmatpush3.msra.mxu0 %v231_v5  ;;  %691 = vmatprep.subr.mxu1 %v231_v5 }
  0x49   : > { %670 = vmatprep.subr.mxu0 %v230_v7  ;;  %699 = vmatpush3.msra.mxu1 %v231_v5 }
  0x4a   : > { %671 = vmatpush3.msra.mxu0 %v230_v7  ;;  %692 = vmatprep.subr.mxu1 %v230_v7 }
  0x4b   : > { %672 = vmatprep.subr.mxu0 %v229_v8  ;;  %700 = vmatpush3.msra.mxu1 %v230_v7 }
  0x4c   : > { %673 = vmatpush3.msra.mxu0 %v229_v8  ;;  %693 = vmatprep.subr.mxu1 %v229_v8 }
  0x4d   : > { %675 = vmatmul.mubr.msk.f32.vlgmr.msra.gmra.mxu0 %vm237_vm0, %v222_v9  ;;  %701 = vmatpush3.msra.mxu1 %v229_v8  ;;  %v441_v8 = vshrl.u32 %v440_v6, 7 }
  0x4e   : > { %677 = vmatprep.mubr.msk.f32.mxu0 %vm237_vm0, %v223_v10  ;;  %680 = vmatprep.mubr.msk.f32.mxu1 %vm237_vm0, %v225_v11 }
  0x4f   : > { %681 = vmatmul.mubr.msk.f32.vlgmr.msra.gmra.mxu1 %vm237_vm0, %v226_v12  ;;  %v442_v9 = vsub.s32 0, %v441_v8 }
  0x50   : > { %683 = vmatprep.mubr.msk.f32.mxu1 %vm237_vm0, %v227_v13 }
  0x51   : > { %678 = vmatmul.mubr.msk.f32.gmra.mxu0 %vm237_vm0, %v224_v14 }
  0x53   : > { %684 = vmatmul.mubr.msk.f32.gmra.mxu1 %vm237_vm0, %v228_v15 }
 0x10d   : > { %v1098_v17 = vpop.f32.mrf.mxu0 }
 0x10e   : > { %v388_v23 = vmul.f32 %v1098_v17, %v1098_v17 }
 0x10f   : > { %v1100_v18 = vpop.f32.mrf.mxu0  ;;  %v1102_v19 = vpop.f32.mrf.mxu1 }
 0x110   : > { %v387_v20 = vmul.f32 %v1100_v18, %v1100_v18  ;;  %v371_v24 = vadd.f32 %v1098_v17, %v1100_v18  ;;  %v392_v37 = vmul.f32 %v1102_v19, %v1102_v19 }
 0x111   : > { %v1106_v21 = vpop.f32.mrf.mxu0  ;;  %v1108_v22 = vpop.f32.mrf.mxu1 }
 0x112   : > { %v395_v26 = vadd.f32 %v388_v23, %v387_v20  ;;  %v390_v30 = vmul.f32 %v1106_v21, %v1106_v21  ;;  %v391_v35 = vmul.f32 %v1108_v22, %v1108_v22 }
 0x113   : > { %v1114_v25 = vpop.f32.mrf.mxu0  ;;  %v1119_v29 = vpop.f32.mrf.mxu1 }
 0x114   : > { %v372_v27 = vadd.f32 %v371_v24, %v1114_v25  ;;  %v389_v28 = vmul.f32 %v1114_v25, %v1114_v25  ;;  %v394_v43 = vmul.f32 %v1119_v29, %v1119_v29 }
 0x115   : > { %v358_v36 = vpop.f32.mrf.mxu1 }
 0x116   : > { %v373_v31 = vadd.f32 %v1106_v21, %v372_v27  ;;  %v396_v32 = vadd.f32 %v395_v26, %v389_v28  ;;  %v393_v41 = vmul.f32 %v358_v36, %v358_v36 }
 0x118   : > { %v397_v33 = vadd.f32 %v396_v32, %v390_v30  ;;  %v374_v34 = vadd.f32 %v373_v31, %v1108_v22 }
 0x11a   : > { %v398_v38 = vadd.f32 %v397_v33, %v391_v35  ;;  %v375_v39 = vadd.f32 %v1102_v19, %v374_v34 }
 0x11c   : > { %v376_v40 = vadd.f32 %v375_v39, %v358_v36  ;;  %v399_v42 = vadd.f32 %v398_v38, %v392_v37 }
 0x11e   : > { %v377_v44 = vadd.f32 %v1119_v29, %v376_v40  ;;  %v400_v45 = vadd.f32 %v399_v42, %v393_v41 }
 0x120   : > { %v378_v46 = vrot.slane %v377_v44, 4  ;;  %v401_v47 = vadd.f32 %v400_v45, %v394_v43 }
 0x122   : > { %v379_v48 = vadd.f32 %v378_v46, %v377_v44  ;;  %v402_v49 = vrot.slane %v401_v47, 4 }
 0x124   : > { %v380_v50 = vrot.slane %v379_v48, 2  ;;  %v403_v51 = vadd.f32 %v402_v49, %v401_v47 }
 0x126   : > { %v381_v52 = vadd.f32 %v380_v50, %v379_v48  ;;  %v404_v53 = vrot.slane %v403_v51, 2 }
 0x128   : > { %v382_v54 = vrot.slane %v381_v52, 1  ;;  %v405_v55 = vadd.f32 %v404_v53, %v403_v51 }
 0x12a   : > { %v383_v57 = vadd.f32 %v382_v54, %v381_v52  ;;  %v406_v58 = vrot.slane %v405_v55, 1 }
 0x12c   : > { %v384_v60 = vadd.f32 %v383_v57, %v370_v56  ;;  %v407_v61 = vadd.f32 %v406_v58, %v405_v55 }
 0x12e   : > { %385 = vst [vmem:[#allocation3] sm:$0x1] %v384_v60  ;;  %v408_v62 = vadd.f32 %v407_v61, %v386_v59 }
 0x130   : > { %409 = vst [vmem:[#allocation4] sm:$0x1] %v408_v62 }
 0x135   : > { %v422_v63 = vld [vmem:[#allocation3] sm:$0x1] }
 0x136   : > { %v423_v0 = vmul.f32 0.015625, %v422_v63 }
 0x137   : > { %v424_v1 = vld [vmem:[#allocation4] sm:$0x1] }
 0x138   : > { %v425_v2 = vmul.f32 0.015625, %v424_v1  ;;  %v426_v3 = vmul.f32 %v423_v0, %v423_v0  ;;  %v443_v10 = vrot.slane %v423_v0, %v442_v9 }
 0x13a   : > { %v427_v4 = vsub.f32 %v425_v2, %v426_v3  ;;  %v451_v12 = vsub.f32 %v358_v36, %v443_v10  ;;  %v445_v14 = vsub.f32 %v1100_v18, %v443_v10  ;;  %v446_v15 = vsub.f32 %v1098_v17, %v443_v10 }
 0x13b   : > { %v447_v16 = vsub.f32 %v1114_v25, %v443_v10  ;;  %v448_v20 = vsub.f32 %v1106_v21, %v443_v10  ;;  %v449_v23 = vsub.f32 %v1108_v22, %v443_v10  ;;  %v450_v24 = vsub.f32 %v1102_v19, %v443_v10 }
 0x13c   : > { %v428_v5 = vmax.f32 %v427_v4, 0.0  ;;  %v452_v26 = vsub.f32 %v1119_v29, %v443_v10 }
 0x13e   : > { %v429_v7 = vadd.f32 1e-05, %v428_v5 }
 0x140   : > { %780 = vrsqrt.f32 %v429_v7 }
 0x14d   : > { %v781_v11 = vpop.eup %780 }
 0x14e   : > { %v457_v13 = vrot.slane %v781_v11, %v442_v9 }
 0x150   : > { %v465_v27 = vmul.f32 %v457_v13, %v451_v12  ;;  %v459_v28 = vmul.f32 %v457_v13, %v445_v14  ;;  %v460_v30 = vmul.f32 %v457_v13, %v446_v15  ;;  %v461_v31 = vmul.f32 %v457_v13, %v447_v16 }
 0x151   : > { %v462_v32 = vmul.f32 %v457_v13, %v448_v20  ;;  %v463_v18 = vmul.f32 %v457_v13, %v449_v23  ;;  %v464_v33 = vmul.f32 %v457_v13, %v450_v24  ;;  %v466_v17 = vmul.f32 %v457_v13, %v452_v26 }
 0x152   : > { %vm473_vm1 = vcmp.ge.f32.partialorder %v465_v27, 0.0  ;;  %v481_v25 = vmul.f32 0.2, %v465_v27  ;;  %vm467_vm2 = vcmp.ge.f32.partialorder %v459_v28, 0.0  ;;  %vm468_vm3 = vcmp.ge.f32.partialorder %v460_v30, 0.0 }
 0x153   : > { %vm469_vm4 = vcmp.ge.f32.partialorder %v461_v31, 0.0  ;;  %vm470_vm5 = vcmp.ge.f32.partialorder %v462_v32, 0.0  ;;  %vm471_vm6 = vcmp.ge.f32.partialorder %v463_v18, 0.0  ;;  %vm472_vm7 = vcmp.ge.f32.partialorder %v464_v33, 0.0 }
 0x154   : > { %v489_v19 = vsel %vm473_vm1, %v465_v27, %v481_v25  ;;  %vm474_vm8 = vcmp.ge.f32.partialorder %v466_v17, 0.0  ;;  %v475_v21 = vmul.f32 0.2, %v459_v28  ;;  %v476_v22 = vmul.f32 0.2, %v460_v30 }
 0x155   : > { %497 = vst [vmem:[%s210_s19 + $0x30] sm:$0xff] %v489_v19  ;;  %v477_v29 = vmul.f32 0.2, %v461_v31  ;;  %v478_v34 = vmul.f32 0.2, %v462_v32 }
 0x156   : > { %v479_v35 = vmul.f32 0.2, %v463_v18  ;;  %v480_v36 = vmul.f32 0.2, %v464_v33  ;;  %v482_v37 = vmul.f32 0.2, %v466_v17  ;;  %v483_v38 = vsel %vm467_vm2, %v459_v28, %v475_v21 }
 0x157   : > { %v484_v39 = vsel %vm468_vm3, %v460_v30, %v476_v22  ;;  %v485_v40 = vsel %vm469_vm4, %v461_v31, %v477_v29  ;;  %v486_v41 = vsel %vm470_vm5, %v462_v32, %v478_v34  ;;  %491 = vst [vmem:[%s210_s19] sm:$0xff] %v483_v38 }
 0x158   : > { %v487_v42 = vsel %vm471_vm6, %v463_v18, %v479_v35  ;;  %492 = vst [vmem:[%s210_s19 + $0x8] sm:$0xff] %v484_v39  ;;  %v488_v43 = vsel %vm472_vm7, %v464_v33, %v480_v36  ;;  %v490_v44 = vsel %vm474_vm8, %v466_v17, %v482_v37  ;;  %493 = vst [vmem:[%s210_s19 + $0x10] sm:$0xff] %v485_v40 }
 0x159   : > { %494 = vst [vmem:[%s210_s19 + $0x18] sm:$0xff] %v486_v41  ;;  %495 = vst [vmem:[%s210_s19 + $0x20] sm:$0xff] %v487_v42 }
 0x15a   : > { %496 = vst [vmem:[%s210_s19 + $0x28] sm:$0xff] %v488_v43  ;;  %498 = vst [vmem:[%s210_s19 + $0x38] sm:$0xff] %v490_v44 }
 0x15b   : > { %849 = shalt.err (!%p846_p5)
}
 0x15c   : > { %s850_s6 = scalar_lea.hbm %s1148_s23, 1024  ;;  %s854_s4 = scalar_lea.hbm %s1205_s2, 2048 }
 0x15d   : > { %p851_p7 = scmp.ne.s32.totalorder %s1148_s23, %s850_s6  ;;  %p855_p9 = scmp.lt.s32.totalorder %s1148_s23, %s1205_s2 }
 0x15e   : > { %p856_p11 = scmp.lt.s32.totalorder %s854_s4, %s850_s6 }
 0x15f   : > { %p852_p4 = pnand %p851_p7, %p1035_p13 }
 0x160   : > { %p857_p10 = por %p856_p11, %p855_p9 }
 0x161   : > { %p853_p6 = pneg %p852_p4 }
 0x163   : > { %p858_p1 = pnand %p857_p10, %p853_p6 }
 0x165   : > { %861 = shalt.err (!%p858_p1)
}
 0x166   : > { %s928_s22 = smov 128   ;;  %s929_s17 = smov 8  }
 0x167   : > { %708 = dma.vmem_to_hbm [thread:$0]  (%p1035_p13), %s1150_s21, 1024, %s1148_s23, %s500_s24, %s928_s22, %s928_s22, %s929_s17  }
 0x168 PF: > { %s528_s19 = sand.u32 1, %s900_s9   ;;  %p1219_p8 = scmp.ne.s32.totalorder %s1211_s20, 0 }
 0x169   : > { %p1220_p12 = scmp.ge.s32.totalorder %s920_s14, 2  ;;  %s529_s28 = scalar_lea.sflag [#allocation7], %s528_s19 }
 0x16b   : > { %p719_p0 = pnand %p1220_p12, %p1219_p8 }
 0x16d   : > { %p720_p2 = pneg %p719_p0 }
 0x16f   : > { %895 = dma.done.wait (%p720_p2), %s529_s28, 1024  }
 0x170   : > { %897 = vsyncadd (%p720_p2), %s529_s28, 4294966272  ;;  %s19_s14 = sadd.s32 1, %s920_s14   ;;  %s1221_s9 = smov %s904_s10 }
 0x171   : > { %p16_p3 = scmp.ge.s32.totalorder %s19_s14, 4   ;;  %s1222_s10 = smov %s908_s11 }
 0x172   : > { %s1223_s11 = smov %s1044_s15  ;;  %s1224_s12 = smov %s916_s13 }
 0x173   : > { %s1225_s13 = smov %s1227_s25  ;;  %18 = sbr.rel (!%p16_p3) target bundleno = 7 (0x7), region = 91 }
 0x178   :  { %534 = vsyncpa [#allocation6], 1 }
 0x179   :  { %536 = vsyncpa [#allocation6 + $0x1], 1 }
 0x17a   :  { %537 = vsyncpa [#allocation9], 1 }
 0x17b   :  { %538 = vsyncpa [#allocation7], 1 }
 0x17c   :  { %540 = vsyncpa [#allocation7 + $0x1], 1 }

</bundles_post_ra>
